<compile_context>
chip_gen: v6e
topology: v6e:2x2x1
jax: 0.10.0
libtpu: 0.0.40
codegen_flags: <defaults>
</compile_context>

<pallas_src>
import jax
import jax.numpy as jnp
from jax.experimental import pallas as pl
from jax.experimental.pallas import tpu as pltpu


def _pooler_kernel(hs_ref, wt_ref, b_ref, out_ref):
    # hs_ref : (TB, 1, H_in)  CLS rows for this batch tile
    # wt_ref : (H_in, H_out)  pre-transposed weight, resident across grid steps
    # b_ref  : (1, H_out)     f32 bias, resident
    # out_ref: (TB, H_out)
    x = hs_ref[:, 0, :].astype(wt_ref.dtype)          # cast to matmul dtype in-VMEM
    y = jnp.dot(x, wt_ref[...],                        # plain [M,K]@[K,N] on the MXU
                preferred_element_type=jnp.float32)    # f32 accumulate
    y = y + b_ref[...]                                 # f32 bias add (broadcast)
    out_ref[...] = jnp.tanh(y).astype(out_ref.dtype)   # EUP tanh in f32, then cast


def prepare_vit_pooler_params(weight, bias, matmul_dtype=jnp.bfloat16):
    """One-time parameter prep (do this at setup, NOT per forward call).

    weight: (H_out, H_in) torch nn.Linear layout.
    Returns (wt, bias2d) with wt = weight.T (H_in, H_out), cast to matmul_dtype
    (bf16 by default — the kernel is HBM-bound, halving weight bytes ~doubles
    throughput), and bias reshaped to (1, H_out) in f32 for the f32 epilogue.
    """
    wt = jnp.asarray(weight).T
    if matmul_dtype is not None:
        wt = wt.astype(matmul_dtype)
    bias2d = jnp.asarray(bias).reshape(1, -1).astype(jnp.float32)
    return wt, bias2d


def vit_pooler(hidden_states: jax.Array,
               wt: jax.Array,
               bias2d: jax.Array,
               *,
               block_b: int = 512,
               out_dtype=None) -> jax.Array:
    """ViTPooler forward.

    hidden_states: (B, S, H_in)
    wt:            (H_in, H_out) pre-transposed weight (see prepare_vit_pooler_params)
    bias2d:        (1, H_out) f32 bias
    """
    B, S, H_in = hidden_states.shape
    H_out = wt.shape[1]
    if out_dtype is None:
        out_dtype = hidden_states.dtype

    # Batch tile: aim for >= 2 grid steps (8-aligned) so the "parallel" axis
    # can shard across both v7x TensorCores; fall back to the full batch when
    # it is too small to split.
    if B > block_b:
        tb = block_b
    else:
        half = ((-(-B // 2)) + 7) // 8 * 8        # round_up(ceil(B/2), 8)
        tb = half if half < B else B
    grid = (pl.cdiv(B, tb),)

    def call(x, single_buffer_params):
        resident_kwargs = (
            {"pipeline_mode": pl.Buffered(1)} if single_buffer_params else {}
        )
        return pl.pallas_call(
            _pooler_kernel,
            out_shape=jax.ShapeDtypeStruct((B, H_out), out_dtype),
            grid_spec=pltpu.PrefetchScalarGridSpec(
                num_scalar_prefetch=0,
                grid=grid,
                in_specs=[
                    # Only the CLS row of each sequence is DMA'd per batch tile.
                    pl.BlockSpec((tb, 1, H_in), lambda i: (i, 0, 0)),
                    # Resident weight / bias: constant index_map, single-buffered.
                    pl.BlockSpec((H_in, H_out), lambda i: (0, 0),
                                 **resident_kwargs),
                    pl.BlockSpec((1, H_out), lambda i: (0, 0),
                                 **resident_kwargs),
                ],
                out_specs=pl.BlockSpec((tb, H_out), lambda i: (i, 0)),
            ),
            compiler_params=pltpu.CompilerParams(
                dimension_semantics=("parallel",),   # megacore sharding on v7x
                # no vmem_limit_bytes: default scoped limit is ample here
            ),
        )(x, wt, bias2d)

    # Fallback ladder: (pre_slice_cls, single_buffer_params). Only needed if a
    # jax version rejects Buffered(1) or the size-1 token-dim block; the math
    # is identical on every path.
    err = None
    for pre_slice, single_buffer in ((False, True), (False, False),
                                     (True, True), (True, False)):
        x = hidden_states[:, 0:1, :] if pre_slice else hidden_states
        try:
            return call(x, single_buffer)
        except Exception as e:   # noqa: BLE001 - fall through to next config
            err = e
    raise err


def vit_pooler_ref(hidden_states, weight, bias):
    first = hidden_states[:, 0]
    return jnp.tanh(first @ weight.T + bias)


if __name__ == "__main__":
    # Small shapes consistent with the module: batch=2, seq=8, hidden=32.
    B, S, H = 2, 8, 32
    key = jax.random.PRNGKey(0)
    k_x, k_w, k_b = jax.random.split(key, 3)

    hidden_states = jax.random.normal(k_x, (B, S, H), dtype=jnp.float32)
    bound = 1.0 / (H ** 0.5)
    weight = jax.random.uniform(k_w, (H, H), minval=-bound, maxval=bound,
                                dtype=jnp.float32)   # torch layout: [out, in]
    bias = jax.random.uniform(k_b, (H,), minval=-bound, maxval=bound,
                              dtype=jnp.float32)

    ref = vit_pooler_ref(hidden_states, weight, bias)

    # f32 matmul path: exact match to the reference.
    wt_f32, b2d = prepare_vit_pooler_params(weight, bias, matmul_dtype=None)
    out_f32 = jax.block_until_ready(vit_pooler(hidden_states, wt_f32, b2d))
    assert out_f32.shape == (B, H)
    assert jnp.allclose(out_f32, ref, atol=1e-5, rtol=1e-5), "f32 mismatch vs reference"

    # Default bf16 matmul-input path (f32 accumulate + f32 tanh epilogue).
    wt_bf16, b2d = prepare_vit_pooler_params(weight, bias)   # bf16 by default
    out_bf16 = jax.block_until_ready(vit_pooler(hidden_states, wt_bf16, b2d))
    assert out_bf16.shape == (B, H)
    assert jnp.allclose(out_bf16, ref, atol=3e-2, rtol=3e-2), "bf16 mismatch vs reference"

    print("KERNEL_OK")
</pallas_src>

<mosaic_0001>
module attributes {stable_mosaic.version = 11 : i64} {
  func.func @_pooler_kernel(%arg0: i32, %arg1: memref<2x1x32xf32, #tpu.memory_space<vmem>>, %arg2: memref<32x32xf32, #tpu.memory_space<vmem>>, %arg3: memref<1x32xf32, #tpu.memory_space<vmem>>, %arg4: memref<2x32xf32, #tpu.memory_space<vmem>>) attributes {dimension_semantics = [#tpu.dimension_semantics<parallel>], iteration_bounds = array<i64: 1>, scalar_prefetch = 0 : i64, scratch_operands = 0 : i64, tpu.core_type = #tpu.core_type<tc>, window_params = [{transform_indices = @transform_0, window_bounds = array<i64: 2, 1, 32>}, {pipeline_mode = #tpu.pipeline_mode<synchronous>, transform_indices = @transform_1, window_bounds = array<i64: 32, 32>}, {pipeline_mode = #tpu.pipeline_mode<synchronous>, transform_indices = @transform_2, window_bounds = array<i64: 1, 32>}, {transform_indices = @transform_3, window_bounds = array<i64: 2, 32>}]} {
    %c0 = arith.constant 0 : index
    %c0_0 = arith.constant 0 : index
    %c0_1 = arith.constant 0 : index
    %0 = vector.load %arg1[%c0, %c0_0, %c0_1] : memref<2x1x32xf32, #tpu.memory_space<vmem>>, vector<2x1x32xf32>
    %1 = vector.shape_cast %0 : vector<2x1x32xf32> to vector<2x32xf32>
    %c0_2 = arith.constant 0 : index
    %c0_3 = arith.constant 0 : index
    %2 = vector.load %arg2[%c0_2, %c0_3] : memref<32x32xf32, #tpu.memory_space<vmem>>, vector<32x32xf32>
    %cst = arith.constant dense<0.000000e+00> : vector<2x32xf32>
    %3 = tpu.matmul %1, %2, %cst {dimension_numbers = #tpu.dot_dimension_numbers<[1], [0], [0], [1], [0, 0, 1, 1], [], []>} : vector<2x32xf32>, vector<32x32xf32>, vector<2x32xf32> -> vector<2x32xf32>
    %c0_4 = arith.constant 0 : index
    %c0_5 = arith.constant 0 : index
    %4 = vector.load %arg3[%c0_4, %c0_5] : memref<1x32xf32, #tpu.memory_space<vmem>>, vector<1x32xf32>
    %5 = vector.broadcast %4 : vector<1x32xf32> to vector<2x32xf32>
    %6 = arith.addf %3, %5 : vector<2x32xf32>
    %7 = math.tanh %6 : vector<2x32xf32>
    %c0_6 = arith.constant 0 : index
    %c0_7 = arith.constant 0 : index
    %8 = vector.load %arg4[%c0_6, %c0_7] : memref<2x32xf32, #tpu.memory_space<vmem>>, vector<2x32xf32>
    tpu.vector_store %arg4[%c0_6, %c0_7], %7 {strides = array<i32>} : memref<2x32xf32, #tpu.memory_space<vmem>>, vector<2x32xf32>,
    return
  }
  func.func @transform_0(%arg0: i32) -> (i32, i32, i32) {
    %c0_i32 = arith.constant 0 : i32
    %c0_i32_0 = arith.constant 0 : i32
    %c0_i32_1 = arith.constant 0 : i32
    return %arg0, %c0_i32, %c0_i32_0 : i32, i32, i32
  }
  func.func @transform_1(%arg0: i32) -> (i32, i32) {
    %c0_i32 = arith.constant 0 : i32
    %c0_i32_0 = arith.constant 0 : i32
    %c0_i32_1 = arith.constant 0 : i32
    return %c0_i32, %c0_i32_0 : i32, i32
  }
  func.func @transform_2(%arg0: i32) -> (i32, i32) {
    %c0_i32 = arith.constant 0 : i32
    %c0_i32_0 = arith.constant 0 : i32
    %c0_i32_1 = arith.constant 0 : i32
    return %c0_i32, %c0_i32_0 : i32, i32
  }
  func.func @transform_3(%arg0: i32) -> (i32, i32) {
    %c0_i32 = arith.constant 0 : i32
    %c0_i32_0 = arith.constant 0 : i32
    return %arg0, %c0_i32 : i32, i32
  }
}

module attributes {stable_mosaic.version = 11 : i64} {
  func.func @_pooler_kernel(%arg0: i32, %arg1: memref<2x1x32xf32, #tpu.memory_space<vmem>>, %arg2: memref<32x32xf32, #tpu.memory_space<vmem>>, %arg3: memref<1x32xf32, #tpu.memory_space<vmem>>, %arg4: memref<2x32xf32, #tpu.memory_space<vmem>>) attributes {dimension_semantics = [#tpu.dimension_semantics<parallel>], iteration_bounds = array<i64: 1>, scalar_prefetch = 0 : i64, scratch_operands = 0 : i64, tpu.core_type = #tpu.core_type<tc>, window_params = [{transform_indices = @transform_0, window_bounds = array<i64: 2, 1, 32>}, {pipeline_mode = #tpu.pipeline_mode<synchronous>, transform_indices = @transform_1, window_bounds = array<i64: 32, 32>}, {pipeline_mode = #tpu.pipeline_mode<synchronous>, transform_indices = @transform_2, window_bounds = array<i64: 1, 32>}, {transform_indices = @transform_3, window_bounds = array<i64: 2, 32>}]} {
    %c0 = arith.constant 0 : index
    %c0_0 = arith.constant 0 : index
    %c0_1 = arith.constant 0 : index
    %0 = vector.load %arg1[%c0, %c0_0, %c0_1] : memref<2x1x32xf32, #tpu.memory_space<vmem>>, vector<2x1x32xf32>
    %1 = vector.shape_cast %0 : vector<2x1x32xf32> to vector<2x32xf32>
    %c0_2 = arith.constant 0 : index
    %c0_3 = arith.constant 0 : index
    %2 = vector.load %arg2[%c0_2, %c0_3] : memref<32x32xf32, #tpu.memory_space<vmem>>, vector<32x32xf32>
    %cst = arith.constant dense<0.000000e+00> : vector<2x32xf32>
    %3 = tpu.matmul %1, %2, %cst {dimension_numbers = #tpu.dot_dimension_numbers<[1], [0], [0], [1], [0, 0, 1, 1], [], []>} : vector<2x32xf32>, vector<32x32xf32>, vector<2x32xf32> -> vector<2x32xf32>
    %c0_4 = arith.constant 0 : index
    %c0_5 = arith.constant 0 : index
    %4 = vector.load %arg3[%c0_4, %c0_5] : memref<1x32xf32, #tpu.memory_space<vmem>>, vector<1x32xf32>
    %5 = vector.broadcast %4 : vector<1x32xf32> to vector<2x32xf32>
    %6 = arith.addf %3, %5 : vector<2x32xf32>
    %7 = math.tanh %6 : vector<2x32xf32>
    %c0_6 = arith.constant 0 : index
    %c0_7 = arith.constant 0 : index
    %8 = vector.load %arg4[%c0_6, %c0_7] : memref<2x32xf32, #tpu.memory_space<vmem>>, vector<2x32xf32>
    tpu.vector_store %arg4[%c0_6, %c0_7], %7 {strides = array<i32>} : memref<2x32xf32, #tpu.memory_space<vmem>>, vector<2x32xf32>,
    return
  }
  func.func @transform_0(%arg0: i32) -> (i32, i32, i32) {
    %c0_i32 = arith.constant 0 : i32
    %c0_i32_0 = arith.constant 0 : i32
    %c0_i32_1 = arith.constant 0 : i32
    return %arg0, %c0_i32, %c0_i32_0 : i32, i32, i32
  }
  func.func @transform_1(%arg0: i32) -> (i32, i32) {
    %c0_i32 = arith.constant 0 : i32
    %c0_i32_0 = arith.constant 0 : i32
    %c0_i32_1 = arith.constant 0 : i32
    return %c0_i32, %c0_i32_0 : i32, i32
  }
  func.func @transform_2(%arg0: i32) -> (i32, i32) {
    %c0_i32 = arith.constant 0 : i32
    %c0_i32_0 = arith.constant 0 : i32
    %c0_i32_1 = arith.constant 0 : i32
    return %c0_i32, %c0_i32_0 : i32, i32
  }
  func.func @transform_3(%arg0: i32) -> (i32, i32) {
    %c0_i32 = arith.constant 0 : i32
    %c0_i32_0 = arith.constant 0 : i32
    return %arg0, %c0_i32 : i32, i32
  }
}

</mosaic_0001>

<bundles_post_ra>
// kernel: tpu_custom_call.1
= control target key start
LH: loop header
LB: loop body
LE: loop exit
PB: predicated region body
PF: predicated region fallthrough
CT: control target
= control target key end

     0   :  { %8 = vsyncpa [#allocation3], 0  ;;  %s303_s0 = inlined_call_operand.hbm [shape: f32[2,1,32], index: 0, kind: input, shape index: {}]   ;;  %s304_s1 = inlined_call_operand.hbm [shape: f32[32,32], index: 1, kind: input, shape index: {}]   ;;  %s305_s2 = inlined_call_operand.vmem [shape: f32[1,32], index: 2, kind: input, shape index: {}]   ;;  %s306_s3 = inlined_call_operand.hbm [shape: f32[2,32], index: 3, kind: output, shape index: {}]  }
   0x1   :  { %9 = vsyncpa [#allocation6], 0 }
   0x2   :  { %10 = vsyncpa [#allocation4], 0  ;;  %s261_s12 = smov [#allocation2]  }
   0x3   :  { %s16_s13 = sshll.u32 %s261_s12, 4  ;;  %s17_s13 = int_to_ptr.vmem [resolvable:$true] %s16_s13 }
   0x4   :  { %s203_s14 = scalar_lea.vmem %s17_s13, 32  ;;  %p208_p1 = scmp.lt.s32.totalorder %s17_s13, %s17_s13 }
   0x5   :  { %p204_p0 = scmp.ne.s32.totalorder %s17_s13, %s203_s14  ;;  %p209_p2 = scmp.lt.s32.totalorder %s203_s14, %s203_s14 }
   0x7   :  { %p210_p3 = por %p209_p2, %p208_p1 }
   0x9   :  { %p211_p4 = pnand %p210_p3, %p204_p0 }
   0xb   :  { %214 = shalt.err (!%p211_p4)
}
   0xc   :  { %s262_s15 = smov 16   ;;  %s263_s16 = smov 1  }
   0xd   :  { %22 = dma.hbm_to_vmem [thread:$0]  %s303_s0, 32, %s17_s13, [#allocation3], %s262_s15, %s262_s15, %s263_s16  }
   0xe   :  { %s264_s19 = smov [#allocation5]  }
   0xf   :  { %s28_s20 = sshll.u32 %s264_s19, 4  ;;  %s29_s20 = int_to_ptr.vmem [resolvable:$true] %s28_s20 }
  0x10   :  { %s223_s21 = scalar_lea.vmem %s29_s20, 512  ;;  %p228_p6 = scmp.lt.s32.totalorder %s29_s20, %s29_s20 }
  0x11   :  { %p224_p5 = scmp.ne.s32.totalorder %s29_s20, %s223_s21  ;;  %p229_p7 = scmp.lt.s32.totalorder %s223_s21, %s223_s21 }
  0x13   :  { %p230_p8 = por %p229_p7, %p228_p6 }
  0x15   :  { %p231_p9 = pnand %p230_p8, %p224_p5 }
  0x17   :  { %234 = shalt.err (!%p231_p9)
}
  0x18   :  { %s265_s22 = smov 128   ;;  %s266_s23 = smov 8  }
  0x19   :  { %34 = dma.hbm_to_vmem [thread:$0]  %s304_s1, 512, %s29_s20, [#allocation6], %s265_s22, %s265_s22, %s266_s23  }
  0x1a   :  { %255 = dma.done.wait [#allocation3], 32  }
  0x1b   :  { %256 = vsyncadd [#allocation3], 4294967264 }
  0x1c   :  { %257 = dma.done.wait [#allocation6], 512  }
  0x1d   :  { %258 = vsyncadd [#allocation6], 4294966784  ;;  %v62_v0 = vlaneseq  ;;  %v267_v1 = vmov 0.0   ;;  %vm268_vm0 = vmmov 0   ;;  %v269_v2 = vmov 1966171168  }
  0x1e   :  { %172 = vmatprep.subr.mxu0 %v267_v1  ;;  %180 = vmatprep.mubr.msk.f32.mxu0 %vm268_vm0, %v267_v1  ;;  %v60_v3 = vunpack.c.l.s4 %v269_v2  ;;  %v48_v6 = vld [vmem:[#allocation5 + $0x18] sm:$0xff]  ;;  %v47_v7 = vld [vmem:[#allocation5 + $0x10] sm:$0xff]  ;;  %v46_v11 = vld [vmem:[#allocation5 + $0x8] sm:$0xff]  ;;  %vm73_vm1 = vcmask 261120   ;;  %s270_s26 = smov [#allocation7]   ;;  %vm147_vm2 = vcmask 254976  }
  0x1f   :  { %v63_v5 = vshrl.u32 %v62_v0, 7  ;;  %173 = vmatpush3.msra.mxu0 %v48_v6  ;;  %v43_v9 = vld [vmem:[#allocation2] sm:$0x1]  ;;  %v44_v10 = vld [vmem:[#allocation2 + $0x1] sm:$0x1]  ;;  %v45_v13 = vld [vmem:[#allocation5] sm:$0xff] }
  0x20   :  { %v61_v4 = vunpack.c.0.s8 %v60_v3  ;;  %174 = vmatprep.subr.mxu0 %v267_v1  ;;  %v58_v12 = vcombine.low %v43_v9, %v44_v10  ;;  %v165_v16 = vld [vmem:[%s305_s2] ss:$0 sm:$0xff]  ;;  %s155_s27 = sshll.u32 %s270_s26, 4  ;;  %s156_s27 = int_to_ptr.vmem [resolvable:$true] %s155_s27 }
  0x21   :  { %175 = vmatpush3.msra.mxu0 %v47_v7  ;;  %s235_s28 = scalar_lea.vmem %s156_s27, 32  ;;  %p240_p11 = scmp.lt.s32.totalorder %s156_s27, %s156_s27 }
  0x22   :  { %v64_v8 = vsub.s32 %v61_v4, %v63_v5  ;;  %176 = vmatprep.subr.mxu0 %v267_v1  ;;  %p236_p10 = scmp.ne.s32.totalorder %s156_s27, %s235_s28  ;;  %p241_p12 = scmp.lt.s32.totalorder %s235_s28, %s235_s28 }
  0x23   :  { %177 = vmatpush3.msra.mxu0 %v46_v11 }
  0x24   :  { %v65_v14 = vrot.slane %v58_v12, %v64_v8  ;;  %178 = vmatprep.subr.mxu0 %v267_v1  ;;  %p242_p13 = por %p241_p12, %p240_p11 }
  0x25   :  { %179 = vmatpush3.msra.mxu0 %v45_v13 }
  0x26   :  { %v72_v15 = vrot.slane %v65_v14, %v64_v8  ;;  %p243_p0 = pnand %p242_p13, %p236_p10 }
  0x28   :  { %181 = vmatmul.mubr.msk.f32.vlgmr.msra.gmra.mxu0 %vm73_vm1, %v72_v15 }
  0xe8   :  { %v142_v17 = vpop.f32.mrf.mxu0 }
  0xe9   :  { %v143_v18 = vadd.f32 %v165_v16, %v142_v17 }
  0xea   :  { %v182_v19 = vpop.f32.mrf.mxu0 }
  0xeb   :  { %193 = vtanh.f32 %v143_v18 }
  0xf8   :  { %v194_v20 = vpop.eup %193 }
  0xf9   :  { %148 = vst.msk [vmem:[#allocation7] sm:$0x3] %vm147_vm2, %v194_v20 }
  0xfa   :  { %246 = shalt.err (!%p243_p0)
}
  0xfb   :  { %158 = dma.vmem_to_hbm [thread:$0]  %s156_s27, 32, %s306_s3, [#allocation4]  }
  0xfc   :  { %259 = dma.done.wait [#allocation4], 32  }
  0xfd   :  { %260 = vsyncadd [#allocation4], 4294967264 }
  0xfe   :  { %162 = vsyncpa [#allocation3], 1 }
  0xff   :  { %163 = vsyncpa [#allocation6], 1 }
 0x100   :  { %164 = vsyncpa [#allocation4], 1 }

// kernel: tpu_custom_call.1
= control target key start
LH: loop header
LB: loop body
LE: loop exit
PB: predicated region body
PF: predicated region fallthrough
CT: control target
= control target key end

     0   :  { %8 = vsyncpa [#allocation3], 0  ;;  %s303_s0 = inlined_call_operand.hbm [shape: f32[2,1,32], index: 0, kind: input, shape index: {}]   ;;  %s304_s1 = inlined_call_operand.hbm [shape: f32[32,32], index: 1, kind: input, shape index: {}]   ;;  %s305_s2 = inlined_call_operand.vmem [shape: f32[1,32], index: 2, kind: input, shape index: {}]   ;;  %s306_s3 = inlined_call_operand.hbm [shape: f32[2,32], index: 3, kind: output, shape index: {}]  }
   0x1   :  { %9 = vsyncpa [#allocation6], 0 }
   0x2   :  { %10 = vsyncpa [#allocation4], 0  ;;  %s261_s12 = smov [#allocation2]  }
   0x3   :  { %s16_s13 = sshll.u32 %s261_s12, 4  ;;  %s17_s13 = int_to_ptr.vmem [resolvable:$true] %s16_s13 }
   0x4   :  { %s203_s14 = scalar_lea.vmem %s17_s13, 32  ;;  %p208_p1 = scmp.lt.s32.totalorder %s17_s13, %s17_s13 }
   0x5   :  { %p204_p0 = scmp.ne.s32.totalorder %s17_s13, %s203_s14  ;;  %p209_p2 = scmp.lt.s32.totalorder %s203_s14, %s203_s14 }
   0x7   :  { %p210_p3 = por %p209_p2, %p208_p1 }
   0x9   :  { %p211_p4 = pnand %p210_p3, %p204_p0 }
   0xb   :  { %214 = shalt.err (!%p211_p4)
}
   0xc   :  { %s262_s15 = smov 16   ;;  %s263_s16 = smov 1  }
   0xd   :  { %22 = dma.hbm_to_vmem [thread:$0]  %s303_s0, 32, %s17_s13, [#allocation3], %s262_s15, %s262_s15, %s263_s16  }
   0xe   :  { %s264_s19 = smov [#allocation5]  }
   0xf   :  { %s28_s20 = sshll.u32 %s264_s19, 4  ;;  %s29_s20 = int_to_ptr.vmem [resolvable:$true] %s28_s20 }
  0x10   :  { %s223_s21 = scalar_lea.vmem %s29_s20, 512  ;;  %p228_p6 = scmp.lt.s32.totalorder %s29_s20, %s29_s20 }
  0x11   :  { %p224_p5 = scmp.ne.s32.totalorder %s29_s20, %s223_s21  ;;  %p229_p7 = scmp.lt.s32.totalorder %s223_s21, %s223_s21 }
  0x13   :  { %p230_p8 = por %p229_p7, %p228_p6 }
  0x15   :  { %p231_p9 = pnand %p230_p8, %p224_p5 }
  0x17   :  { %234 = shalt.err (!%p231_p9)
}
  0x18   :  { %s265_s22 = smov 128   ;;  %s266_s23 = smov 8  }
  0x19   :  { %34 = dma.hbm_to_vmem [thread:$0]  %s304_s1, 512, %s29_s20, [#allocation6], %s265_s22, %s265_s22, %s266_s23  }
  0x1a   :  { %255 = dma.done.wait [#allocation3], 32  }
  0x1b   :  { %256 = vsyncadd [#allocation3], 4294967264 }
  0x1c   :  { %257 = dma.done.wait [#allocation6], 512  }
  0x1d   :  { %258 = vsyncadd [#allocation6], 4294966784  ;;  %v62_v0 = vlaneseq  ;;  %v267_v1 = vmov 0.0   ;;  %vm268_vm0 = vmmov 0   ;;  %v269_v2 = vmov 1966171168  }
  0x1e   :  { %172 = vmatprep.subr.mxu0 %v267_v1  ;;  %180 = vmatprep.mubr.msk.f32.mxu0 %vm268_vm0, %v267_v1  ;;  %v60_v3 = vunpack.c.l.s4 %v269_v2  ;;  %v48_v6 = vld [vmem:[#allocation5 + $0x18] sm:$0xff]  ;;  %v47_v7 = vld [vmem:[#allocation5 + $0x10] sm:$0xff]  ;;  %v46_v11 = vld [vmem:[#allocation5 + $0x8] sm:$0xff]  ;;  %vm73_vm1 = vcmask 261120   ;;  %s270_s26 = smov [#allocation7]   ;;  %vm147_vm2 = vcmask 254976  }
  0x1f   :  { %v63_v5 = vshrl.u32 %v62_v0, 7  ;;  %173 = vmatpush3.msra.mxu0 %v48_v6  ;;  %v43_v9 = vld [vmem:[#allocation2] sm:$0x1]  ;;  %v44_v10 = vld [vmem:[#allocation2 + $0x1] sm:$0x1]  ;;  %v45_v13 = vld [vmem:[#allocation5] sm:$0xff] }
  0x20   :  { %v61_v4 = vunpack.c.0.s8 %v60_v3  ;;  %174 = vmatprep.subr.mxu0 %v267_v1  ;;  %v58_v12 = vcombine.low %v43_v9, %v44_v10  ;;  %v165_v16 = vld [vmem:[%s305_s2] ss:$0 sm:$0xff]  ;;  %s155_s27 = sshll.u32 %s270_s26, 4  ;;  %s156_s27 = int_to_ptr.vmem [resolvable:$true] %s155_s27 }
  0x21   :  { %175 = vmatpush3.msra.mxu0 %v47_v7  ;;  %s235_s28 = scalar_lea.vmem %s156_s27, 32  ;;  %p240_p11 = scmp.lt.s32.totalorder %s156_s27, %s156_s27 }
  0x22   :  { %v64_v8 = vsub.s32 %v61_v4, %v63_v5  ;;  %176 = vmatprep.subr.mxu0 %v267_v1  ;;  %p236_p10 = scmp.ne.s32.totalorder %s156_s27, %s235_s28  ;;  %p241_p12 = scmp.lt.s32.totalorder %s235_s28, %s235_s28 }
  0x23   :  { %177 = vmatpush3.msra.mxu0 %v46_v11 }
  0x24   :  { %v65_v14 = vrot.slane %v58_v12, %v64_v8  ;;  %178 = vmatprep.subr.mxu0 %v267_v1  ;;  %p242_p13 = por %p241_p12, %p240_p11 }
  0x25   :  { %179 = vmatpush3.msra.mxu0 %v45_v13 }
  0x26   :  { %v72_v15 = vrot.slane %v65_v14, %v64_v8  ;;  %p243_p0 = pnand %p242_p13, %p236_p10 }
  0x28   :  { %181 = vmatmul.mubr.msk.f32.vlgmr.msra.gmra.mxu0 %vm73_vm1, %v72_v15 }
  0xe8   :  { %v142_v17 = vpop.f32.mrf.mxu0 }
  0xe9   :  { %v143_v18 = vadd.f32 %v165_v16, %v142_v17 }
  0xea   :  { %v182_v19 = vpop.f32.mrf.mxu0 }
  0xeb   :  { %193 = vtanh.f32 %v143_v18 }
  0xf8   :  { %v194_v20 = vpop.eup %193 }
  0xf9   :  { %148 = vst.msk [vmem:[#allocation7] sm:$0x3] %vm147_vm2, %v194_v20 }
  0xfa   :  { %246 = shalt.err (!%p243_p0)
}
  0xfb   :  { %158 = dma.vmem_to_hbm [thread:$0]  %s156_s27, 32, %s306_s3, [#allocation4]  }
  0xfc   :  { %259 = dma.done.wait [#allocation4], 32  }
  0xfd   :  { %260 = vsyncadd [#allocation4], 4294967264 }
  0xfe   :  { %162 = vsyncpa [#allocation3], 1 }
  0xff   :  { %163 = vsyncpa [#allocation6], 1 }
 0x100   :  { %164 = vsyncpa [#allocation4], 1 }

</bundles_post_ra>
